<compile_context>
chip_gen: v5e
topology: v5e:2x2
jax: 0.10.0
libtpu: 0.0.40
codegen_flags: <defaults>
</compile_context>

<pallas_src>
import jax
import jax.numpy as jnp
from jax.experimental import pallas as pl
from jax.experimental.pallas import tpu as pltpu


def _inception_kernel(x_ref, w_ref, s_ref, b_ref, o_ref):
    # x_ref : (1, 9*Cin, TM)  bf16  im2col columns for TM output pixels (pixels on lanes)
    # w_ref : (Ctot, 9*Cin)   bf16  fused [1x1 | 3x3] weight (1x1 in center-tap columns)
    # s_ref : (Ctot, 1)       f32   folded BN scale (both branches concatenated)
    # b_ref : (Ctot, 1)       f32   folded BN bias
    # o_ref : (1, Ctot, TM)   f32   channel-major output tile (pixels on lanes)
    y = jnp.dot(w_ref[...], x_ref[0], preferred_element_type=jnp.float32)  # (Ctot, TM)
    y = jnp.maximum(y * s_ref[...] + b_ref[...], 0.0)                      # fused BN + ReLU
    o_ref[0] = y.astype(o_ref.dtype)                                       # lane-dense store


def inception_forward(x_nchw, w1, w3, bn1, bn3, eps=1e-3, compute_dtype=jnp.bfloat16):
    """x_nchw: (N, Cin, H, W); w1: (C1, Cin, 1, 1); w3: (C3, Cin, 3, 3);
    bn* = (gamma, beta, running_mean, running_var).  Returns (N, C1+C3, H, W)."""
    N, Cin, H, W = x_nchw.shape
    C1, C3 = w1.shape[0], w3.shape[0]
    Ctot = C1 + C3
    HW = H * W
    K = 9 * Cin

    # ---- im2col straight from NCHW: (N, 9*Cin, H*W), tap-major (ky, kx, cin) --
    x_pad = jnp.pad(x_nchw, ((0, 0), (0, 0), (1, 1), (1, 1)))
    cols = jnp.concatenate(
        [x_pad[:, :, dy:dy + H, dx:dx + W] for dy in range(3) for dx in range(3)],
        axis=1)                                                    # (N, 9*Cin, H, W)
    x_cols = cols.reshape(N, K, HW).astype(compute_dtype)

    # ---- fused weight: rows [0:C1] = 1x1 (center tap only), rows [C1:] = 3x3 --
    w1_mat = w1[:, :, 0, 0]                                        # (C1, Cin)
    w3_mat = jnp.transpose(w3, (0, 2, 3, 1)).reshape(C3, K)        # (C3, 9*Cin)
    w_cmb = jnp.zeros((Ctot, K), jnp.float32)
    w_cmb = w_cmb.at[:C1, 4 * Cin:5 * Cin].set(w1_mat)             # center tap (ky=kx=1)
    w_cmb = w_cmb.at[C1:, :].set(w3_mat)
    w_cmb = w_cmb.astype(compute_dtype)

    # ---- fold eval-mode BatchNorm into per-channel scale / bias --------------
    def fold(bn):
        gamma, beta, mean, var = bn
        s = gamma / jnp.sqrt(var + eps)
        return s, beta - mean * s

    s1, b1 = fold(bn1)
    s3, b3 = fold(bn3)
    scale = jnp.concatenate([s1, s3]).reshape(Ctot, 1).astype(jnp.float32)
    bias = jnp.concatenate([b1, b3]).reshape(Ctot, 1).astype(jnp.float32)

    # ---- tiling: pixel tiles of 128 lanes when possible (>=4 grid points) -----
    TM = 128 if HW % 128 == 0 else HW
    grid = (N, HW // TM)

    out_flat = pl.pallas_call(
        _inception_kernel,
        out_shape=jax.ShapeDtypeStruct((N, Ctot, HW), jnp.float32),
        grid_spec=pltpu.PrefetchScalarGridSpec(
            num_scalar_prefetch=0,
            grid=grid,
            in_specs=[
                pl.BlockSpec((1, K, TM), lambda n, m: (n, 0, m)),
                pl.BlockSpec((Ctot, K), lambda n, m: (0, 0)),
                pl.BlockSpec((Ctot, 1), lambda n, m: (0, 0)),
                pl.BlockSpec((Ctot, 1), lambda n, m: (0, 0)),
            ],
            out_specs=pl.BlockSpec((1, Ctot, TM), lambda n, m: (n, 0, m)),
        ),
        compiler_params=pltpu.CompilerParams(
            dimension_semantics=("parallel", "parallel")),
    )(x_cols, w_cmb, scale, bias)

    # Free metadata reshape: (N, Ctot, H*W) -> (N, Ctot, H, W) (already NCHW).
    return out_flat.reshape(N, Ctot, H, W)


def _reference(x, w1, w3, bn1, bn3, eps=1e-3):
    """Pure-JAX reference matching PyTorch (eval-mode BN)."""
    def branch(xx, w, bn, pad):
        y = jax.lax.conv_general_dilated(
            xx, w, window_strides=(1, 1), padding=[(pad, pad), (pad, pad)],
            dimension_numbers=("NCHW", "OIHW", "NCHW"))
        gamma, beta, mean, var = bn
        s = (gamma / jnp.sqrt(var + eps)).reshape(1, -1, 1, 1)
        b = (beta - mean * gamma / jnp.sqrt(var + eps)).reshape(1, -1, 1, 1)
        return jnp.maximum(y * s + b, 0.0)
    return jnp.concatenate([branch(x, w1, bn1, 0), branch(x, w3, bn3, 1)], axis=1)


if __name__ == "__main__":
    key = jax.random.PRNGKey(0)
    N, Cin, H, W = 2, 4, 16, 16
    C1, C3 = 8, 16

    k = jax.random.split(key, 10)
    x = jax.random.normal(k[0], (N, Cin, H, W), dtype=jnp.float32)

    # Deterministic "Conv2d" weights (no bias, matching the module).
    w1 = jax.random.normal(k[1], (C1, Cin, 1, 1), dtype=jnp.float32) * 0.2
    w3 = jax.random.normal(k[2], (C3, Cin, 3, 3), dtype=jnp.float32) * 0.1

    # Deterministic BatchNorm params (gamma, beta, running_mean, running_var).
    bn1 = (jax.random.uniform(k[3], (C1,), minval=0.5, maxval=1.5),
           jax.random.normal(k[4], (C1,)) * 0.1,
           jax.random.normal(k[5], (C1,)) * 0.1,
           jax.random.uniform(k[6], (C1,), minval=0.5, maxval=1.5))
    bn3 = (jax.random.uniform(k[7], (C3,), minval=0.5, maxval=1.5),
           jax.random.normal(k[8], (C3,)) * 0.1,
           jax.random.normal(k[9], (C3,)) * 0.1,
           jax.random.uniform(k[3], (C3,), minval=0.5, maxval=1.5))

    fwd = jax.jit(inception_forward)
    out = jax.block_until_ready(fwd(x, w1, w3, bn1, bn3))
    assert out.shape == (N, C1 + C3, H, W), out.shape

    # Tight check against a bf16-quantized-input reference (matches kernel's
    # bf16 operands), loose check against the pure-f32 reference.
    def q(a):
        return a.astype(jnp.bfloat16).astype(jnp.float32)

    ref_q = _reference(q(x), q(w1), q(w3), bn1, bn3)
    ref_f = _reference(x, w1, w3, bn1, bn3)
    assert jnp.allclose(out, ref_q, atol=2e-3, rtol=2e-3), \
        float(jnp.max(jnp.abs(out - ref_q)))
    assert jnp.allclose(out, ref_f, atol=5e-2, rtol=5e-2), \
        float(jnp.max(jnp.abs(out - ref_f)))

    print("KERNEL_OK")
</pallas_src>

<mosaic_0001>
module attributes {stable_mosaic.version = 11 : i64} {
  func.func @_inception_kernel(%arg0: i32, %arg1: i32, %arg2: memref<1x36x128xbf16, #tpu.memory_space<vmem>>, %arg3: memref<24x36xbf16, #tpu.memory_space<vmem>>, %arg4: memref<24x1xf32, #tpu.memory_space<vmem>>, %arg5: memref<24x1xf32, #tpu.memory_space<vmem>>, %arg6: memref<1x24x128xf32, #tpu.memory_space<vmem>>) attributes {dimension_semantics = [#tpu.dimension_semantics<parallel>, #tpu.dimension_semantics<parallel>], iteration_bounds = array<i64: 2, 2>, scalar_prefetch = 0 : i64, scratch_operands = 0 : i64, tpu.core_type = #tpu.core_type<tc>, window_params = [{transform_indices = @transform_0, window_bounds = array<i64: 1, 36, 128>}, {pipeline_mode = #tpu.pipeline_mode<synchronous>, transform_indices = @transform_1, window_bounds = array<i64: 24, 36>}, {pipeline_mode = #tpu.pipeline_mode<synchronous>, transform_indices = @transform_2, window_bounds = array<i64: 24, 1>}, {pipeline_mode = #tpu.pipeline_mode<synchronous>, transform_indices = @transform_3, window_bounds = array<i64: 24, 1>}, {transform_indices = @transform_4, window_bounds = array<i64: 1, 24, 128>}]} {
    %c0 = arith.constant 0 : index
    %c0_0 = arith.constant 0 : index
    %0 = vector.load %arg3[%c0, %c0_0] : memref<24x36xbf16, #tpu.memory_space<vmem>>, vector<24x36xbf16>
    %c0_1 = arith.constant 0 : index
    %c0_2 = arith.constant 0 : index
    %c0_3 = arith.constant 0 : index
    %1 = vector.load %arg2[%c0_1, %c0_2, %c0_3] : memref<1x36x128xbf16, #tpu.memory_space<vmem>>, vector<1x36x128xbf16>
    %2 = vector.shape_cast %1 : vector<1x36x128xbf16> to vector<36x128xbf16>
    %cst = arith.constant dense<0.000000e+00> : vector<24x128xf32>
    %3 = tpu.matmul %0, %2, %cst {dimension_numbers = #tpu.dot_dimension_numbers<[1], [0], [0], [1], [0, 0, 1, 1], [], []>} : vector<24x36xbf16>, vector<36x128xbf16>, vector<24x128xf32> -> vector<24x128xf32>
    %c0_4 = arith.constant 0 : index
    %c0_5 = arith.constant 0 : index
    %4 = vector.load %arg4[%c0_4, %c0_5] : memref<24x1xf32, #tpu.memory_space<vmem>>, vector<24x1xf32>
    %5 = vector.broadcast %4 : vector<24x1xf32> to vector<24x128xf32>
    %6 = arith.mulf %3, %5 : vector<24x128xf32>
    %c0_6 = arith.constant 0 : index
    %c0_7 = arith.constant 0 : index
    %7 = vector.load %arg5[%c0_6, %c0_7] : memref<24x1xf32, #tpu.memory_space<vmem>>, vector<24x1xf32>
    %8 = vector.broadcast %7 : vector<24x1xf32> to vector<24x128xf32>
    %9 = arith.addf %6, %8 : vector<24x128xf32>
    %cst_8 = arith.constant 0.000000e+00 : f32
    %10 = vector.broadcast %cst_8 : f32 to vector<24x128xf32>
    %11 = arith.maximumf %9, %10 : vector<24x128xf32>
    %c0_9 = arith.constant 0 : index
    %c0_10 = arith.constant 0 : index
    %c0_11 = arith.constant 0 : index
    %12 = vector.load %arg6[%c0_9, %c0_10, %c0_11] : memref<1x24x128xf32, #tpu.memory_space<vmem>>, vector<1x24x128xf32>
    %13 = vector.shape_cast %12 : vector<1x24x128xf32> to vector<24x128xf32>
    %14 = vector.shape_cast %11 : vector<24x128xf32> to vector<1x24x128xf32>
    tpu.vector_store %arg6[%c0_9, %c0_10, %c0_11], %14 {strides = array<i32>} : memref<1x24x128xf32, #tpu.memory_space<vmem>>, vector<1x24x128xf32>,
    return
  }
  func.func @transform_0(%arg0: i32, %arg1: i32) -> (i32, i32, i32) {
    %c0_i32 = arith.constant 0 : i32
    %c0_i32_0 = arith.constant 0 : i32
    return %arg0, %c0_i32, %arg1 : i32, i32, i32
  }
  func.func @transform_1(%arg0: i32, %arg1: i32) -> (i32, i32) {
    %c0_i32 = arith.constant 0 : i32
    %c0_i32_0 = arith.constant 0 : i32
    %c0_i32_1 = arith.constant 0 : i32
    return %c0_i32, %c0_i32_0 : i32, i32
  }
  func.func @transform_2(%arg0: i32, %arg1: i32) -> (i32, i32) {
    %c0_i32 = arith.constant 0 : i32
    %c0_i32_0 = arith.constant 0 : i32
    %c0_i32_1 = arith.constant 0 : i32
    return %c0_i32, %c0_i32_0 : i32, i32
  }
  func.func @transform_3(%arg0: i32, %arg1: i32) -> (i32, i32) {
    %c0_i32 = arith.constant 0 : i32
    %c0_i32_0 = arith.constant 0 : i32
    %c0_i32_1 = arith.constant 0 : i32
    return %c0_i32, %c0_i32_0 : i32, i32
  }
  func.func @transform_4(%arg0: i32, %arg1: i32) -> (i32, i32, i32) {
    %c0_i32 = arith.constant 0 : i32
    %c0_i32_0 = arith.constant 0 : i32
    return %arg0, %c0_i32, %arg1 : i32, i32, i32
  }
}

</mosaic_0001>

<bundles_post_ra>
// kernel: inception_forward.1
= control target key start
LH: loop header
LB: loop body
LE: loop exit
PB: predicated region body
PF: predicated region fallthrough
CT: control target
= control target key end

     0   :  { %s678_s15 = smov 0   ;;  %s680_s16 = smov 0   ;;  %s802_s0 = inlined_call_operand.vmem [shape: bf16[2,36,256], index: 0, kind: input, shape index: {}]   ;;  %s803_s1 = inlined_call_operand.vmem [shape: bf16[24,36], index: 1, kind: input, shape index: {}]   ;;  %s804_s2 = inlined_call_operand.vmem [shape: f32[24,1], index: 2, kind: input, shape index: {}]   ;;  %s805_s3 = inlined_call_operand.vmem [shape: f32[24,1], index: 3, kind: input, shape index: {}]   ;;  %s806_s4 = inlined_call_operand.vmem [shape: f32[2,24,256], index: 4, kind: output, shape index: {}]  }
   0x1   :  { %s682_s17 = smov 0   ;;  %s684_s18 = smov 0  }
   0x2   :  { %s686_s19 = smov 0   ;;  %s688_s20 = smov 0  }
   0x3   :  { %s690_s21 = smov 0  }
   0x4 LB: > { %s23_s22 = sadd.s32 1, %s642_s19  ;;  %s26_s23 = sadd.s32 1, %s646_s20  ;;  %s650_s21 = sphi %s690_s21, %s14_s21   ;;  %s646_s20 = sphi %s688_s20, %s813_s20   ;;  %s642_s19 = sphi %s686_s19, %s812_s19   ;;  %s638_s18 = sphi %s684_s18, %s811_s18   ;;  %s634_s17 = sphi %s682_s17, %s810_s17   ;;  %s630_s16 = sphi %s680_s16, %s809_s16   ;;  %s626_s15 = sphi %s678_s15, %s808_s15  }
   0x5   : > { %p24_p0 = scmp.ge.s32.totalorder %s23_s22, 2  ;;  %s502_s24 = sadd.s32 4294967295, %s650_s21  }
   0x6   : > { %p42_p1 = scmp.ne.s32.totalorder %s630_s16, %s626_s15  ;;  %p43_p2 = scmp.eq.s32.totalorder %s650_s21, 0 }
   0x7   : > { %s815_s22 = smov (%p24_p0, %s23_s22), 0  ;;  %s817_s23 = smov (!%p24_p0, %s26_s23), %s646_s20 }
   0x8   : > { %p28_p3 = scmp.ge.s32.totalorder %s817_s23, 2  ;;  %p137_p4 = scmp.eq.s32.totalorder %s502_s24, 3 }
   0x9   : > { %s31_s25 = ssub.s32 %s642_s19, %s815_s22  ;;  %p44_p5 = por %p43_p2, %p42_p1 }
   0xa   : > { %s819_s23 = smov (%p28_p3, %s817_s23), 0  ;;  %p726_p6 = por %p137_p4, %p42_p1 }
   0xb   : > { %s30_s27 = ssub.s32 %s646_s20, %s819_s23  ;;  %s35_s29 = sadd.s32 1, %s630_s16 }
   0xc   : > { %s32_s28 = sor.u32 %s31_s25, %s30_s27  ;;  %p505_p8 = scmp.ge.s32.totalorder %s650_s21, 4 }
   0xd   : > { %p33_p7 = scmp.eq.s32.totalorder %s32_s28, 0 }
   0xe   : > { %168 = sbr.rel (%p505_p8) target bundleno = 31 (0x1f), region = 28 }
   0xf   : > { %s734_s30 = scalar_select %p33_p7, %s630_s16, %s35_s29  }
  0x13   : > { %171 = sbr.rel (!%p44_p5) target bundleno = 31 (0x1f), region = 32  ;;  %s173_s5 = sand.u32 (%p44_p5), 1, %s630_s16  }
  0x14   : > { %s532_s6 = smul.u32 (%p44_p5), 10, %s646_s20 }
  0x15   : > { %s531_s7 = smul.u32 (%p44_p5), 20, %s173_s5 }
  0x16   : > { %s177_s8 = sadd.s32 (%p44_p5), %s642_s19, %s532_s6 }
  0x17   : > { %s506_s9 = sshll.u32 (%p44_p5), %s177_s8, 2  ;;  %s175_s13 = scalar_lea.vmem (%p44_p5), [#allocation2], %s531_s7 }
  0x18   : > { %s179_s12 = scalar_lea.vmem %s802_s0, %s506_s9 }
  0x19   : > { %v196_v0 = vld [vmem:[%s179_s12] sm:$0xf]  ;;  %v198_v1 = vld [vmem:[%s179_s12 + $0x8] sm:$0xf]  ;;  %v200_v2 = vld [vmem:[%s179_s12 + $0x10] sm:$0xf] }
  0x1a   : > { %197 = vst [vmem:[%s175_s13] sm:$0xf] %v196_v0  ;;  %v202_v3 = vld [vmem:[%s179_s12 + $0x18] sm:$0xf]  ;;  %v204_v4 = vld [vmem:[%s179_s12 + $0x20] sm:$0xf] }
  0x1b   : > { %199 = vst [vmem:[%s175_s13 + $0x4] sm:$0xf] %v198_v1 }
  0x1c   : > { %201 = vst [vmem:[%s175_s13 + $0x8] sm:$0xf] %v200_v2 }
  0x1d   : > { %203 = vst [vmem:[%s175_s13 + $0xc] sm:$0xf] %v202_v3 }
  0x1e   : > { %205 = vst [vmem:[%s175_s13 + $0x10] sm:$0xf] %v204_v4 }
  0x1f PF: > { %p507_p9 = scmp.ge.s32.totalorder %s650_s21, 1  ;;  %p238_p10 = scmp.lt.s32.totalorder %s650_s21, 5 }
  0x21   : > { %p239_p11 = pnand %p507_p9, %p238_p10 }
  0x22   : > { %s245_s14 = sand.u32 (!%p239_p11), 1, %s626_s15  }
  0x23   : > { %242 = sbr.rel (%p239_p11) target bundleno = 207 (0xcf), region = 73 }
  0x24   : > { %s533_s24 = smul.u32 (!%p239_p11), 20, %s245_s14 }
  0x25   : > { %s534_s29 = smul.u32 (!%p239_p11), 24, %s245_s14 }
  0x26   : > { %s247_s7 = scalar_lea.vmem (!%p239_p11), [#allocation2], %s533_s24 }
  0x27   : > { %s268_s5 = scalar_lea.vmem (!%p239_p11), [#allocation3], %s534_s29 }
  0x28   : > { %v330_v5 = vld [vmem:[%s804_s2] sm:$0xff]  ;;  %v332_v6 = vld [vmem:[%s804_s2 + $0x10] sm:$0xff]  ;;  %v652_v7 = vmov 0   ;;  %v352_v8 = vld [vmem:[%s805_s3 + $0x8] sm:$0xff]  ;;  %vm308_vm0 = vcmask 1041408   ;;  %vm301_vm1 = vcmask 293888  }
  0x29   : > { %593 = vset.pattern.permute.xlu0 %v652_v7  ;;  %594 = vset.pattern.permute.xlu1 %v652_v7  ;;  %v277_v9 = vld [vmem:[%s247_s7 + $0x10] sm:$0x3]  ;;  %v331_v12 = vld [vmem:[%s804_s2 + $0x8] sm:$0xff]  ;;  %v526_v19 = vld [vmem:[%s247_s7] sm:$0xff]  ;;  %s535_s15 = smul.u32 (%p726_p6), 6, %s638_s18 }
  0x2a   : > { %335 = vperm.xlu0 %593, %v330_v5   ;;  %345 = vperm.xlu1 %594, %v332_v6   ;;  %v295_v10 = vunpack.c.l.b16 %v277_v9  ;;  %v351_v13 = vld [vmem:[%s805_s3] sm:$0xff]  ;;  %v272_v16 = vld [vmem:[%s803_s1 + $0x8] sm:$0xf]  ;;  %v353_v17 = vld [vmem:[%s805_s3 + $0x10] sm:$0xff] }
  0x2b   : > { %595 = vset.pattern.permute.xlu2 %v652_v7  ;;  %v527_v15 = vld [vmem:[%s247_s7 + $0x8] sm:$0xff]  ;;  %v283_v18 = vunpack.c.l.b16 %v272_v16  ;;  %s386_s14 = sadd.s32 (%p726_p6), %s634_s17, %s535_s15 }
  0x2c   : > { %361 = vperm.xlu2 %595, %v352_v8   ;;  %v298_v11 = vpack.c.b16 %v295_v10, %v295_v10  ;;  %v525_v20 = vld [vmem:[%s803_s1] sm:$0xff]  ;;  %s522_s6 = sshll.u32 (%p726_p6), %s386_s14, 3 }
  0x2d   : > { %v285_v21 = vpack.c.b16 %v283_v18, %v283_v18  ;;  %s388_s9 = scalar_lea.vmem (%p726_p6), %s806_s4, %s522_s6 }
  0x2e   : > { %v310_v14 = vsel %vm308_vm0, %v298_v11, 0 }
  0x2f   : > { %317 = vmatpush.bf16.msra.mxu0 %v310_v14  ;;  %528 = vmatpush.bf16.msra.mxu1 %v310_v14 }
  0x32   : > { %340 = vperm.xlu0 %593, %v331_v12   ;;  %356 = vperm.xlu1 %594, %v351_v13  }
  0x33   : > { %318 = vmatpush.bf16.msra.mxu0 %v527_v15  ;;  %529 = vmatpush.bf16.msra.mxu1 %v527_v15 }
  0x34   : > { %366 = vperm.xlu2 %595, %v353_v17  }
  0x37   : > { %319 = vmatpush.bf16.msra.mxu0 %v526_v19  ;;  %530 = vmatpush.bf16.msra.mxu1 %v526_v19 }
  0x3a   : > { %520 = vmatmul.msk.bf16.vlgmr.msra.gmra.mxu0 %vm301_vm1, %v525_v20  ;;  %521 = vmatmul.msk.bf16.vlgmr.msra.gmra.mxu1 %vm301_vm1, %v285_v21 }
  0x86   : > { %v362_v22 = vpop.permute.xlu2 %361 }
  0x8e   : > { %v367_v25 = vpop.permute.xlu2 %366 }
  0x9c   : > { %v346_v23 = vpop.permute.xlu1 %345  ;;  %v336_v24 = vpop.permute.xlu0 %335 }
  0xa4   : > { %v357_v26 = vpop.permute.xlu1 %356  ;;  %v341_v35 = vpop.permute.xlu0 %340 }
  0xb7   : > { %v321_v27 = vpop.f32.mrf.mxu0  ;;  %v326_v28 = vpop.f32.mrf.mxu1 }
  0xb8   : > { %v348_v29 = vmul.f32 %v336_v24, %v321_v27  ;;  %v350_v30 = vmul.f32 %v346_v23, %v326_v28 }
  0xba   : > { %v371_v31 = vadd.f32 %v367_v25, %v350_v30  ;;  %v369_v32 = vadd.f32 %v357_v26, %v348_v29 }
  0xbc   : > { %v374_v33 = vmax.f32 %v371_v31, 0.0  ;;  %v372_v34 = vmax.f32 %v369_v32, 0.0 }
  0xbe   : > { %377 = vst [vmem:[%s268_s5 + $0x10] sm:$0xff] %v374_v33 }
  0xbf   : > { %375 = vst [vmem:[%s268_s5] sm:$0xff] %v372_v34  ;;  %v323_v36 = vpop.f32.mrf.mxu0  ;;  %v328_v37 = vpop.f32.mrf.mxu1 }
  0xc0   : > { %v349_v38 = vmul.f32 %v341_v35, %v323_v36 }
  0xc2   : > { %v370_v39 = vadd.f32 %v362_v22, %v349_v38  ;;  %384 = sbr.rel (!%p726_p6) target bundleno = 207 (0xcf), region = 81 }
  0xc4   : > { %v373_v40 = vmax.f32 %v370_v39, 0.0 }
  0xc5   : > { %v425_v43 = vld [vmem:[%s268_s5 + $0x10] sm:$0xff] (%p726_p6) }
  0xc6   : > { %376 = vst [vmem:[%s268_s5 + $0x8] sm:$0xff] %v373_v40  ;;  %v421_v41 = vld [vmem:[%s268_s5] sm:$0xff] (%p726_p6) }
  0xc7   : > { %422 = vst [vmem:[%s388_s9] sm:$0xff] %v421_v41 }
  0xc8   : > { %426 = vst [vmem:[%s388_s9 + $0x20] sm:$0xff] %v425_v43 }
  0xcd   : > { %v423_v42 = vld [vmem:[%s268_s5 + $0x8] sm:$0xff] }
  0xce   : > { %424 = vst [vmem:[%s388_s9 + $0x10] sm:$0xff] %v423_v42 }
  0xcf PF: > { %s14_s21 = sadd.s32 1, %s650_s21   ;;  %s808_s15 = smov %s630_s16 }
  0xd0   : > { %p11_p12 = scmp.ge.s32.totalorder %s14_s21, 6   ;;  %s809_s16 = smov %s734_s30 }
  0xd1   : > { %s810_s17 = smov %s642_s19  ;;  %s811_s18 = smov %s646_s20 }
  0xd2   : > { %s812_s19 = smov %s815_s22  ;;  %s813_s20 = smov %s819_s23 }
  0xd3   :  { %13 = sbr.rel (!%p11_p12) target bundleno = 4 (0x4), region = 150 }

</bundles_post_ra>
